<compile_context>
chip_gen: v7x
topology: tpu7x:2x2x1
jax: 0.10.0
libtpu: 0.0.40
codegen_flags: <defaults>
</compile_context>

<pallas_src>
import functools
import math

import numpy as np
import jax
import jax.numpy as jnp
from jax import lax
from jax.experimental import pallas as pl
from jax.experimental.pallas import tpu as pltpu


# ----------------------------------------------------------------------------
# Tiling / VMEM helpers
# ----------------------------------------------------------------------------

_TILE_CANDIDATES = (2048, 1024, 512, 256, 128, 64, 32, 16, 8)


def _round_up(x, m):
    return ((x + m - 1) // m) * m


def _padded_bytes(shape, dtype):
    """VMEM footprint of ONE buffer of `shape`, including (8,128) layout padding."""
    s = [int(d) for d in shape]
    if len(s) >= 1:
        s[-1] = _round_up(s[-1], 128)
    if len(s) >= 2:
        s[-2] = _round_up(s[-2], 8)
    n = 1
    for d in s:
        n *= d
    return n * jnp.dtype(dtype).itemsize


def _vmem_limit_bytes():
    """Scoped VMEM budget: ~3/4 of physical.

    v5e/v6e have 128 MiB physical -> ~96 MiB budget; v7x has 64 MiB -> ~48 MiB."""
    cap = None
    try:
        info = pltpu.get_tpu_info()
        for name in ("vmem_capacity_bytes", "vmem_bytes", "vmem_size_bytes"):
            val = getattr(info, name, None)
            if isinstance(val, (int, np.integer)) and int(val) > 0:
                cap = int(val)
                break
    except Exception:
        cap = None
    if cap is None:
        cap = 128 * 1024 * 1024
        try:
            if "v7" in jax.devices()[0].device_kind.lower():
                cap = 64 * 1024 * 1024
        except Exception:
            pass
    return (cap * 3) // 4


def _exp_dtype():
    """bf16 exp on v6e/v7x (bf16 EUP doubles exp throughput); f32 elsewhere."""
    try:
        kind = jax.devices()[0].device_kind.lower()
    except Exception:
        return jnp.float32
    if "v6" in kind or "v7" in kind:
        return jnp.bfloat16
    return jnp.float32


def _pick_tile(n, fits):
    """Biggest tile dividing n that fits the VMEM budget (whole axis first)."""
    if fits(n):
        return n
    divisors = [t for t in _TILE_CANDIDATES if t < n and n % t == 0]
    for t in divisors:  # descending
        if fits(t):
            assert n % t == 0
            return t
    choice = divisors[-1] if divisors else n  # smallest divisor as last resort
    assert n % choice == 0, f"no tile dividing {n} fits the VMEM budget"
    return choice


# ----------------------------------------------------------------------------
# Kernel A: fused QKV projection (one bf16 matmul, one lane-dense slab store)
# ----------------------------------------------------------------------------

def _qkv_projection_kernel(xt_ref, wt_ref, bt_ref, qkvt_ref):
    # (3*H*D, dim_in) @ (dim_in, TN) -> (3*H*D, TN); bf16 MXU, f32 accumulate.
    res = jnp.dot(wt_ref[...], xt_ref[...], preferred_element_type=jnp.float32)
    res = res + bt_ref[...]                      # (3*H*D, 1) lane broadcast
    qkvt_ref[...] = res.astype(qkvt_ref.dtype)   # single lane-dense slab store


# ----------------------------------------------------------------------------
# Kernel B: attention, grid = (head, q-tile); one head's K/V resident per step
# ----------------------------------------------------------------------------

def _attention_kernel(qt_ref, kt_ref, vt_ref, outt_ref, attn_ref, *,
                      exp_dtype, compute_dtype):
    # qt (D, TQ), kt (D, N), vt (D, N)  -- all bf16, softmax scale pre-folded.
    # S = Q_h K_h^T : contract over D (dim 0 of both operands)  -> (TQ, N) f32.
    s = lax.dot_general(qt_ref[...], kt_ref[...],
                        dimension_numbers=(((0,), (0,)), ((), ())),
                        preferred_element_type=jnp.float32)
    # Numerically stable softmax; exp in bf16 on v6e/v7x (EUP), f32 on v5e.
    m = jnp.max(s, axis=-1, keepdims=True)
    p = jnp.exp((s - m).astype(exp_dtype)).astype(jnp.float32)
    inv = pl.reciprocal(jnp.sum(p, axis=-1, keepdims=True), approx=False)
    attn_c = (p * inv).astype(compute_dtype)          # single bf16 cast, reused
    attn_ref[0] = attn_c.astype(attn_ref.dtype)       # (TQ, N) lane-dense store
    # out_t[d, q] = sum_n v_t[d, n] * attn[q, n]  -> (D, TQ), lane-dense store.
    outt_ref[...] = lax.dot_general(vt_ref[...], attn_c,
                                    dimension_numbers=(((1,), (1,)), ((), ())),
                                    preferred_element_type=jnp.float32
                                    ).astype(outt_ref.dtype)


# ----------------------------------------------------------------------------
# Wrapper
# ----------------------------------------------------------------------------

def self_attention_forward(x, wq, bq, wk, bk, wv, bv, *, num_heads, dim_out,
                           compute_dtype=jnp.bfloat16, attn_dtype=jnp.bfloat16):
    """Returns (out (N, H*D) in x.dtype, attn (H, N, N) attn_dtype).

    Weights use the packed nn.Linear layout: w* (dim_in, H*D), b* (H*D,)."""
    N, dim_in = x.shape
    H, D = num_heads, dim_out
    HD3 = 3 * H * D
    scale = 1.0 / math.sqrt(float(D))

    # Fused, transposed (node axis last -> lane-dense) QKV weights in bf16;
    # the 1/sqrt(D) softmax scale is folded into Wq/bq on the host (free).
    w_qkv_t = jnp.concatenate([wq.T * scale, wk.T, wv.T],
                              axis=0).astype(compute_dtype)           # (3HD, dim_in)
    b_qkv_t = jnp.concatenate([bq * scale, bk, bv],
                              axis=0)[:, None].astype(jnp.float32)    # (3HD, 1)
    x_t = jnp.transpose(x).astype(compute_dtype)                      # (dim_in, N)

    vmem_limit = _vmem_limit_bytes()
    slack = 4 << 20
    exp_dtype = _exp_dtype()
    cdt = compute_dtype

    # ---------------- Kernel A: fused QKV projection ----------------
    # VMEM model includes the 2x double-buffer on EVERY block (also the
    # constant-index weights/bias) and (8,128) layout padding.
    def fits_a(tn):
        used = (2 * _padded_bytes((dim_in, tn), cdt)        # x_t tile
                + 2 * _padded_bytes((HD3, dim_in), cdt)     # fused weights
                + 2 * _padded_bytes((HD3, 1), jnp.float32)  # fused bias
                + 2 * _padded_bytes((HD3, tn), cdt)         # qkv_t out tile
                + _padded_bytes((HD3, tn), jnp.float32))    # f32 matmul result
        return used <= vmem_limit - slack

    TN = _pick_tile(N, fits_a)

    qkv_t = pl.pallas_call(
        _qkv_projection_kernel,
        out_shape=jax.ShapeDtypeStruct((HD3, N), compute_dtype),
        grid_spec=pltpu.PrefetchScalarGridSpec(
            num_scalar_prefetch=0,
            grid=(N // TN,),
            in_specs=[
                pl.BlockSpec((dim_in, TN), lambda i: (0, i)),      # x_t column tile
                pl.BlockSpec((HD3, dim_in), lambda i: (0, 0)),     # fused weights
                pl.BlockSpec((HD3, 1), lambda i: (0, 0)),          # fused bias
            ],
            out_specs=pl.BlockSpec((HD3, TN), lambda i: (0, i)),   # qkv_t slab
        ),
        compiler_params=pltpu.CompilerParams(
            dimension_semantics=("parallel",),
            vmem_limit_bytes=vmem_limit),
    )(x_t, w_qkv_t, b_qkv_t)

    # ---------------- Kernel B: (head, q-tile)-gridded attention ----------------
    def fits_b(tq):
        used = (2 * _padded_bytes((D, tq), cdt)                  # q tile
                + 2 * 2 * _padded_bytes((D, N), cdt)             # K + V (one head)
                + 2 * _padded_bytes((D, tq), jnp.float32)        # out_t tile
                + 2 * _padded_bytes((tq, N), attn_dtype)         # attn tile
                + 3 * _padded_bytes((tq, N), jnp.float32))       # s / p intermediates
        return used <= vmem_limit - slack

    TQ = _pick_tile(N, fits_b)

    attn_kernel = functools.partial(_attention_kernel,
                                    exp_dtype=exp_dtype, compute_dtype=cdt)
    out_t, attn = pl.pallas_call(
        attn_kernel,
        out_shape=(
            jax.ShapeDtypeStruct((H * D, N), jnp.float32),   # transposed out
            jax.ShapeDtypeStruct((H, N, N), attn_dtype),
        ),
        grid_spec=pltpu.PrefetchScalarGridSpec(
            num_scalar_prefetch=0,
            grid=(H, N // TQ),
            in_specs=[
                pl.BlockSpec((D, TQ), lambda h, i: (h, i)),          # Q_h tile
                pl.BlockSpec((D, N), lambda h, i: (H + h, 0)),       # K_h resident
                pl.BlockSpec((D, N), lambda h, i: (2 * H + h, 0)),   # V_h resident
            ],
            out_specs=[
                pl.BlockSpec((D, TQ), lambda h, i: (h, i)),          # out_t, lane-dense
                pl.BlockSpec((1, TQ, N), lambda h, i: (h, i, 0)),    # attn, lane-dense
            ],
        ),
        compiler_params=pltpu.CompilerParams(
            dimension_semantics=("parallel", "parallel"),
            vmem_limit_bytes=vmem_limit),
    )(qkv_t, qkv_t, qkv_t)

    # Tiny XLA transpose back to the module's (N, H*D) layout (N*H*D*4 bytes,
    # negligible vs. the H*N^2 attn writeback).
    out = jnp.transpose(out_t).astype(x.dtype)
    return out, attn


def per_graph_attention(attn, batch):
    # TODO(synk): variable-size boolean masking (attn[:, mask][:, :, mask]) has
    # no clean static-shape Pallas equivalent; done as host/numpy glue.
    attn_np = np.asarray(attn.astype(jnp.float32))
    batch_np = np.asarray(batch)
    graph_attn = []
    for g in np.unique(batch_np):
        idx = np.where(batch_np == g)[0]
        graph_attn.append(attn_np[:, idx][:, :, idx])
    return graph_attn


# ----------------------------------------------------------------------------
# Pure-JAX reference (mirrors the PyTorch forward)
# ----------------------------------------------------------------------------

def _reference(x, wq, bq, wk, bk, wv, bv, num_heads, dim_out):
    N = x.shape[0]
    H, D = num_heads, dim_out

    def proj(w, b):
        y = x @ w + b                                   # (N, H*D)
        return jnp.transpose(y.reshape(N, H, D), (1, 0, 2))

    q, k, v = proj(wq, bq), proj(wk, bk), proj(wv, bv)
    s = jnp.einsum("hqd,hkd->hqk", q, k) / math.sqrt(D)
    attn = jax.nn.softmax(s, axis=-1)
    out = jnp.einsum("hqk,hkd->hqd", attn, v)
    out = jnp.transpose(out, (1, 0, 2)).reshape(N, H * D)
    return out, attn


if __name__ == "__main__":
    # Small shapes consistent with the module: N nodes, dim_in features.
    N, dim_in, dim_out, num_heads = 8, 32, 16, 2

    key = jax.random.PRNGKey(0)
    kx, kq, kbq, kk, kbk, kv, kbv = jax.random.split(key, 7)

    x = jax.random.normal(kx, (N, dim_in), dtype=jnp.float32)
    batch = jnp.array([0, 0, 0, 1, 1, 1, 1, 1], dtype=jnp.int32)

    # nn.Linear-like init, packed layout: weight (dim_in, H*D), bias (H*D,).
    bound = 1.0 / math.sqrt(dim_in)
    HD = num_heads * dim_out
    wq = jax.random.uniform(kq, (dim_in, HD), jnp.float32, -bound, bound)
    bq = jax.random.uniform(kbq, (HD,), jnp.float32, -bound, bound)
    wk = jax.random.uniform(kk, (dim_in, HD), jnp.float32, -bound, bound)
    bk = jax.random.uniform(kbk, (HD,), jnp.float32, -bound, bound)
    wv = jax.random.uniform(kv, (dim_in, HD), jnp.float32, -bound, bound)
    bv = jax.random.uniform(kbv, (HD,), jnp.float32, -bound, bound)

    out, attn = self_attention_forward(
        x, wq, bq, wk, bk, wv, bv, num_heads=num_heads, dim_out=dim_out)
    out = jax.block_until_ready(out)
    attn = jax.block_until_ready(attn)

    graph_attn_weights = per_graph_attention(attn, batch)

    # Correctness check against a pure-JAX f32 reference.  bf16 MXU inputs and
    # bf16 attn writeback -> loosened tolerances (semantics unchanged).
    out_ref, attn_ref = _reference(x, wq, bq, wk, bk, wv, bv, num_heads, dim_out)
    np.testing.assert_allclose(np.asarray(out), np.asarray(out_ref),
                               rtol=2e-2, atol=2e-2)
    np.testing.assert_allclose(np.asarray(attn.astype(jnp.float32)),
                               np.asarray(attn_ref), rtol=2e-2, atol=2e-2)
    assert out.shape == (N, num_heads * dim_out)
    assert len(graph_attn_weights) == 2
    assert graph_attn_weights[0].shape == (num_heads, 3, 3)
    assert graph_attn_weights[1].shape == (num_heads, 5, 5)

    print("KERNEL_OK")
</pallas_src>

<mosaic_0001>
module attributes {stable_mosaic.version = 11 : i64} {
  func.func @_qkv_projection_kernel(%arg0: i32, %arg1: memref<32x8xbf16, #tpu.memory_space<vmem>>, %arg2: memref<96x32xbf16, #tpu.memory_space<vmem>>, %arg3: memref<96x1xf32, #tpu.memory_space<vmem>>, %arg4: memref<96x8xbf16, #tpu.memory_space<vmem>>) attributes {dimension_semantics = [#tpu.dimension_semantics<parallel>], iteration_bounds = array<i64: 1>, scalar_prefetch = 0 : i64, scratch_operands = 0 : i64, tpu.core_type = #tpu.core_type<tc>, window_params = [{transform_indices = @transform_0, window_bounds = array<i64: 32, 8>}, {pipeline_mode = #tpu.pipeline_mode<synchronous>, transform_indices = @transform_1, window_bounds = array<i64: 96, 32>}, {pipeline_mode = #tpu.pipeline_mode<synchronous>, transform_indices = @transform_2, window_bounds = array<i64: 96, 1>}, {transform_indices = @transform_3, window_bounds = array<i64: 96, 8>}]} {
    %c0 = arith.constant 0 : index
    %c0_0 = arith.constant 0 : index
    %0 = vector.load %arg2[%c0, %c0_0] : memref<96x32xbf16, #tpu.memory_space<vmem>>, vector<96x32xbf16>
    %c0_1 = arith.constant 0 : index
    %c0_2 = arith.constant 0 : index
    %1 = vector.load %arg1[%c0_1, %c0_2] : memref<32x8xbf16, #tpu.memory_space<vmem>>, vector<32x8xbf16>
    %cst = arith.constant dense<0.000000e+00> : vector<96x8xf32>
    %2 = tpu.matmul %0, %1, %cst {dimension_numbers = #tpu.dot_dimension_numbers<[1], [0], [0], [1], [0, 0, 1, 1], [], []>} : vector<96x32xbf16>, vector<32x8xbf16>, vector<96x8xf32> -> vector<96x8xf32>
    %c0_3 = arith.constant 0 : index
    %c0_4 = arith.constant 0 : index
    %3 = vector.load %arg3[%c0_3, %c0_4] : memref<96x1xf32, #tpu.memory_space<vmem>>, vector<96x1xf32>
    %4 = vector.broadcast %3 : vector<96x1xf32> to vector<96x8xf32>
    %5 = arith.addf %2, %4 : vector<96x8xf32>
    %6 = arith.truncf %5 : vector<96x8xf32> to vector<96x8xbf16>
    %c0_5 = arith.constant 0 : index
    %c0_6 = arith.constant 0 : index
    %7 = vector.load %arg4[%c0_5, %c0_6] : memref<96x8xbf16, #tpu.memory_space<vmem>>, vector<96x8xbf16>
    tpu.vector_store %arg4[%c0_5, %c0_6], %6 {strides = array<i32>} : memref<96x8xbf16, #tpu.memory_space<vmem>>, vector<96x8xbf16>,
    return
  }
  func.func @transform_0(%arg0: i32) -> (i32, i32) {
    %c0_i32 = arith.constant 0 : i32
    %c0_i32_0 = arith.constant 0 : i32
    return %c0_i32, %arg0 : i32, i32
  }
  func.func @transform_1(%arg0: i32) -> (i32, i32) {
    %c0_i32 = arith.constant 0 : i32
    %c0_i32_0 = arith.constant 0 : i32
    %c0_i32_1 = arith.constant 0 : i32
    return %c0_i32, %c0_i32_0 : i32, i32
  }
  func.func @transform_2(%arg0: i32) -> (i32, i32) {
    %c0_i32 = arith.constant 0 : i32
    %c0_i32_0 = arith.constant 0 : i32
    %c0_i32_1 = arith.constant 0 : i32
    return %c0_i32, %c0_i32_0 : i32, i32
  }
  func.func @transform_3(%arg0: i32) -> (i32, i32) {
    %c0_i32 = arith.constant 0 : i32
    %c0_i32_0 = arith.constant 0 : i32
    return %c0_i32, %arg0 : i32, i32
  }
}

</mosaic_0001>

<bundles_post_ra>
// kernel: tpu_custom_call.1
= control target key start
LH: loop header
LB: loop body
LE: loop exit
PB: predicated region body
PF: predicated region fallthrough
CT: control target
= control target key end

     0   :  { %8 = vsyncpa [#allocation3], 0  ;;  %s656_s0 = inlined_call_operand.hbm [shape: bf16[32,8], index: 0, kind: input, shape index: {}]   ;;  %s657_s1 = inlined_call_operand.hbm [shape: bf16[96,32], index: 1, kind: input, shape index: {}]   ;;  %s658_s2 = inlined_call_operand.hbm [shape: f32[96,1], index: 2, kind: input, shape index: {}]   ;;  %s659_s3 = inlined_call_operand.hbm [shape: bf16[96,8], index: 3, kind: output, shape index: {}]  }
   0x1   :  { %9 = vsyncpa [#allocation6], 0 }
   0x2   :  { %10 = vsyncpa [#allocation4], 0  ;;  %s545_s12 = smov [#allocation5]   ;;  %s546_s14 = smov [#allocation2]  }
   0x3   :  { %s28_s13 = sshll.u32 %s545_s12, 4  ;;  %s16_s15 = sshll.u32 %s546_s14, 4  ;;  %s29_s13 = int_to_ptr.vmem [resolvable:$true] %s28_s13  ;;  %s574_s15 = int_to_ptr.vmem [resolvable:$true] %s16_s15 }
   0x4   :  { %s451_s18 = scalar_lea.hbm %s657_s1, 768 }
   0x5   :  { %p452_p0 = scmp.ne.s32.totalorder %s657_s1, %s451_s18  ;;  %p455_p1 = scmp.lt.u32.totalorder %s451_s18, %s657_s1 }
   0x7   :  { %p457_p2 = pnand %p455_p1, %p452_p0 }
   0x9   :  { %460 = shalt.err (!%p457_p2)
}
   0xa   :  { %s461_s23 = scalar_lea.vmem %s29_s13, 768  ;;  %p466_p4 = scmp.lt.s32.totalorder %s29_s13, %s29_s13 }
   0xb   :  { %p462_p3 = scmp.ne.s32.totalorder %s29_s13, %s461_s23  ;;  %p467_p5 = scmp.lt.s32.totalorder %s461_s23, %s461_s23 }
   0xd   :  { %p468_p6 = por %p467_p5, %p466_p4 }
   0xf   :  { %p469_p7 = pnand %p468_p6, %p462_p3 }
  0x11   :  { %472 = shalt.err (!%p469_p7)
}
  0x12   :  { %s547_s24 = smov 64   ;;  %s548_s25 = smov 4  }
  0x13   :  { %34 = dma.hbm_to_vmem [thread:$0]  %s657_s1, 768, %s29_s13, [#allocation6], %s547_s24, %s547_s24, %s548_s25  }
  0x14   :  { %s473_s30 = scalar_lea.hbm %s656_s0, 256 }
  0x15   :  { %p474_p8 = scmp.ne.s32.totalorder %s656_s0, %s473_s30  ;;  %p477_p9 = scmp.lt.u32.totalorder %s473_s30, %s656_s0 }
  0x17   :  { %p479_p10 = pnand %p477_p9, %p474_p8 }
  0x19   :  { %482 = shalt.err (!%p479_p10)
}
  0x1a   :  { %s483_s8 = scalar_lea.vmem %s574_s15, 256  ;;  %p488_p12 = scmp.lt.s32.totalorder %s574_s15, %s574_s15 }
  0x1b   :  { %p484_p11 = scmp.ne.s32.totalorder %s574_s15, %s483_s8  ;;  %p489_p13 = scmp.lt.s32.totalorder %s483_s8, %s483_s8 }
  0x1d   :  { %p490_p0 = por %p489_p13, %p488_p12 }
  0x1f   :  { %p491_p1 = pnand %p490_p0, %p484_p11 }
  0x21   :  { %494 = shalt.err (!%p491_p1)
}
  0x22   :  { %22 = dma.hbm_to_vmem [thread:$0]  %s656_s0, 256, %s574_s15, [#allocation3], %s547_s24, %s547_s24, %s548_s25  }
  0x23   :  { %s549_s10 = smov [#allocation7]   ;;  %s495_s14 = scalar_lea.hbm %s658_s2, 1536 }
  0x24   :  { %s40_s11 = sshll.u32 %s549_s10, 4  ;;  %p496_p2 = scmp.ne.s32.totalorder %s658_s2, %s495_s14  ;;  %s41_s11 = int_to_ptr.vmem [resolvable:$true] %s40_s11 }
  0x25   :  { %p499_p3 = scmp.lt.u32.totalorder %s495_s14, %s658_s2 }
  0x27   :  { %p501_p4 = pnand %p499_p3, %p496_p2 }
  0x29   :  { %504 = shalt.err (!%p501_p4)
}
  0x2a   :  { %s505_s20 = scalar_lea.vmem %s41_s11, 1536  ;;  %p510_p6 = scmp.lt.s32.totalorder %s41_s11, %s41_s11 }
  0x2b   :  { %p506_p5 = scmp.ne.s32.totalorder %s41_s11, %s505_s20  ;;  %p511_p7 = scmp.lt.s32.totalorder %s505_s20, %s505_s20 }
  0x2d   :  { %p512_p8 = por %p511_p7, %p510_p6 }
  0x2f   :  { %p513_p9 = pnand %p512_p8, %p506_p5 }
  0x31   :  { %516 = shalt.err (!%p513_p9)
}
  0x32   :  { %s550_s0 = smov 128   ;;  %s551_s15 = smov 8  }
  0x33   :  { %46 = dma.hbm_to_vmem [thread:$0]  %s658_s2, 1536, %s41_s11, [#allocation6], %s550_s0, %s550_s0, %s551_s15  }
  0x34   :  { %539 = dma.done.wait [#allocation3], 256  }
  0x35   :  { %540 = vsyncadd [#allocation3], 4294967040 }
  0x36   :  { %541 = dma.done.wait [#allocation6], 2304  }
  0x37   :  { %542 = vsyncadd [#allocation6], 4294964992  ;;  %v552_v0 = vmov 0   ;;  %v443_v1 = vld [vmem:[#allocation2] sm:$0xff]   ;;  %v444_v2 = vld [vmem:[#allocation2 + $0x8] sm:$0xff]   ;;  %vm187_vm0 = vcmask 261120  }
  0x38   :  { %442 = vset.pattern.permute.xlu1 %v552_v0  ;;  %441 = vset.pattern.permute.xlu0 %v552_v0  ;;  %v445_v3 = vld [vmem:[#allocation5] sm:$0xff]   ;;  %v446_v4 = vld [vmem:[#allocation5 + $0x10] sm:$0xff]   ;;  %v447_v5 = vld [vmem:[#allocation5 + $0x8] sm:$0xff]   ;;  %vm335_vm1 = vcmask 60416   ;;  %s553_s2 = smov [#allocation8]  }
  0x39   :  { %412 = vmatprep.subr.bf16.mxu0 %v443_v1  ;;  %428 = vmatprep.subr.bf16.mxu1 %v443_v1  ;;  %v448_v6 = vld [vmem:[#allocation5 + $0x18] sm:$0xff]   ;;  %v449_v7 = vld [vmem:[#allocation5 + $0x20] sm:$0xff]   ;;  %v73_v9 = vld [vmem:[#allocation7] sm:$0xff]  ;;  %s353_s23 = sshll.u32 %s553_s2, 4  ;;  %s354_s23 = int_to_ptr.vmem [resolvable:$true] %s353_s23 }
  0x3a   :  { %413 = vmatpush3.bf16.msra.mxu0 %v443_v1  ;;  %430 = vmatpush3.bf16.msra.mxu1 %v443_v1  ;;  %v75_v8 = vld [vmem:[#allocation7 + $0x10] sm:$0xff]  ;;  %v76_v10 = vld [vmem:[#allocation7 + $0x18] sm:$0xff]  ;;  %v74_v11 = vld [vmem:[#allocation7 + $0x8] sm:$0xff]  ;;  %s517_s26 = scalar_lea.vmem %s354_s23, 768  ;;  %p522_p11 = scmp.lt.s32.totalorder %s354_s23, %s354_s23 }
  0x3b   :  { %414 = vmatprep.subr.bf16.mxu0 %v444_v2  ;;  %429 = vmatprep.subr.bf16.mxu1 %v444_v2  ;;  %v450_v12 = vld [vmem:[#allocation5 + $0x28] sm:$0xff]   ;;  %v78_v13 = vld [vmem:[#allocation7 + $0x28] sm:$0xff]  ;;  %v77_v14 = vld [vmem:[#allocation7 + $0x20] sm:$0xff]  ;;  %p518_p10 = scmp.ne.s32.totalorder %s354_s23, %s517_s26  ;;  %p523_p12 = scmp.lt.s32.totalorder %s517_s26, %s517_s26 }
  0x3c   :  { %416 = vmatprep.mubr.msk.bf16.mxu0 %vm187_vm0, %v445_v3  ;;  %420 = vmatprep.mubr.msk.bf16.mxu1 %vm187_vm0, %v446_v4  ;;  %v80_v15 = vld [vmem:[#allocation7 + $0x38] sm:$0xff]  ;;  %v79_v16 = vld [vmem:[#allocation7 + $0x30] sm:$0xff]  ;;  %v82_v17 = vld [vmem:[#allocation7 + $0x48] sm:$0xff] }
  0x3d   :  { %97 = vperm.xlu1 %442, %v75_v8   ;;  %87 = vperm.xlu0 %441, %v73_v9   ;;  %v81_v18 = vld [vmem:[#allocation7 + $0x40] sm:$0xff]  ;;  %v84_v19 = vld [vmem:[#allocation7 + $0x58] sm:$0xff]  ;;  %v83_v20 = vld [vmem:[#allocation7 + $0x50] sm:$0xff]  ;;  %p524_p13 = por %p523_p12, %p522_p11 }
  0x3e   :  { %415 = vmatpush3.bf16.msra.mxu0 %v444_v2  ;;  %431 = vmatpush3.bf16.msra.mxu1 %v444_v2 }
  0x3f   :  { %p525_p0 = pnand %p524_p13, %p518_p10 }
  0x41   :  { %417 = vmatmul.mubr.msk.bf16.vlgmr.msra.gmra.mrb[0].mxu0 %vm187_vm0, %v447_v5  ;;  %421 = vmatmul.mubr.msk.bf16.vlgmr.msra.gmra.mrb[0].mxu1 %vm187_vm0, %v448_v6 }
  0x42   :  { %424 = vmatprep.mubr.msk.bf16.mxu1 %vm187_vm0, %v449_v7  ;;  %102 = vperm.xlu1 %442, %v76_v10  }
  0x43   :  { %92 = vperm.xlu0 %441, %v74_v11  }
  0x46   :  { %112 = vperm.xlu1 %442, %v78_v13  }
  0x47   :  { %107 = vperm.xlu0 %441, %v77_v14  }
  0x49   :  { %425 = vmatmul.mubr.msk.bf16.gmra.mrb[4].mxu1 %vm187_vm0, %v450_v12 }
  0x4a   :  { %122 = vperm.xlu1 %442, %v80_v15  }
  0x4b   :  { %117 = vperm.xlu0 %441, %v79_v16  }
  0x4e   :  { %132 = vperm.xlu1 %442, %v82_v17  }
  0x4f   :  { %127 = vperm.xlu0 %441, %v81_v18  }
  0x52   :  { %142 = vperm.xlu1 %442, %v84_v19  }
  0x53   :  { %137 = vperm.xlu0 %441, %v83_v20  }
  0xbc   :  { %v88_v21 = vpop.permute.xlu0 %87  ;;  %v98_v22 = vpop.permute.xlu1 %97 }
  0xc1   :  { %v103_v24 = vpop.permute.xlu1 %102 }
  0xc2   :  { %v93_v23 = vpop.permute.xlu0 %92 }
  0xc5   :  { %v113_v26 = vpop.permute.xlu1 %112 }
  0xc6   :  { %v108_v25 = vpop.permute.xlu0 %107 }
  0xc9   :  { %v123_v28 = vpop.permute.xlu1 %122 }
  0xca   :  { %v118_v27 = vpop.permute.xlu0 %117 }
  0xcd   :  { %v133_v46 = vpop.permute.xlu1 %132 }
  0xce   :  { %v128_v29 = vpop.permute.xlu0 %127 }
  0xd1   :  { %v143_v59 = vpop.permute.xlu1 %142 }
  0xd2   :  { %v138_v55 = vpop.permute.xlu0 %137 }
 0x114   :  { %v418_v30 = vpop.f32.mrb[0].mxu0  ;;  %v422_v31 = vpop.f32.mrb[0].mxu1 }
 0x115   :  { %v249_v32 = vadd.f32 %v418_v30, %v98_v22  ;;  %v265_v33 = vadd.f32 %v422_v31, %v118_v27  ;;  %v240_v34 = vpop.f32.mrb[1].mxu0  ;;  %v256_v35 = vpop.f32.mrb[1].mxu1 }
 0x116   :  { %v241_v36 = vadd.f32 %v240_v34, %v88_v21  ;;  %v257_v37 = vadd.f32 %v256_v35, %v108_v25  ;;  %v419_v38 = vpop.f32.mrb[2].mxu0  ;;  %v423_v39 = vpop.f32.mrb[2].mxu1 }
 0x117   :  { %v394_v40 = vpack.c.bf16 %v249_v32, %v249_v32  ;;  %v398_v41 = vpack.c.bf16 %v265_v33, %v265_v33  ;;  %v252_v42 = vadd.f32 %v419_v38, %v103_v24  ;;  %v268_v43 = vadd.f32 %v423_v39, %v123_v28  ;;  %v243_v44 = vpop.f32.mrb[3].mxu0  ;;  %v259_v45 = vpop.f32.mrb[3].mxu1 }
 0x118   :  { %v392_v47 = vpack.c.bf16 %v241_v36, %v241_v36  ;;  %v396_v48 = vpack.c.bf16 %v257_v37, %v257_v37  ;;  %v244_v49 = vadd.f32 %v243_v44, %v93_v23  ;;  %v260_v50 = vadd.f32 %v259_v45, %v113_v26 }
 0x119   :  { %338 = vst.msk [vmem:[#allocation8 + $0x8] sm:$0xf] %vm335_vm1, %v394_v40  ;;  %342 = vst.msk [vmem:[#allocation8 + $0x18] sm:$0xf] %vm335_vm1, %v398_v41  ;;  %v395_v51 = vpack.c.bf16 %v252_v42, %v252_v42  ;;  %v399_v52 = vpack.c.bf16 %v268_v43, %v268_v43 }
 0x11a   :  { %336 = vst.msk [vmem:[#allocation8] sm:$0xf] %vm335_vm1, %v392_v47  ;;  %340 = vst.msk [vmem:[#allocation8 + $0x10] sm:$0xf] %vm335_vm1, %v396_v48  ;;  %v393_v53 = vpack.c.bf16 %v244_v49, %v244_v49  ;;  %v397_v54 = vpack.c.bf16 %v260_v50, %v260_v50 }
 0x11b   :  { %339 = vst.msk [vmem:[#allocation8 + $0xc] sm:$0xf] %vm335_vm1, %v395_v51  ;;  %343 = vst.msk [vmem:[#allocation8 + $0x1c] sm:$0xf] %vm335_vm1, %v399_v52 }
 0x11c   :  { %337 = vst.msk [vmem:[#allocation8 + $0x4] sm:$0xf] %vm335_vm1, %v393_v53  ;;  %341 = vst.msk [vmem:[#allocation8 + $0x14] sm:$0xf] %vm335_vm1, %v397_v54  ;;  %v426_v56 = vpop.f32.mrb[4].mxu1 }
 0x11d   :  { %v281_v57 = vadd.f32 %v426_v56, %v138_v55  ;;  %v272_v58 = vpop.f32.mrb[5].mxu1 }
 0x11e   :  { %v273_v60 = vadd.f32 %v272_v58, %v128_v29  ;;  %v427_v61 = vpop.f32.mrb[6].mxu1 }
 0x11f   :  { %v402_v62 = vpack.c.bf16 %v281_v57, %v281_v57  ;;  %v284_v63 = vadd.f32 %v427_v61, %v143_v59  ;;  %v275_v0 = vpop.f32.mrb[7].mxu1 }
 0x120   :  { %v400_v1 = vpack.c.bf16 %v273_v60, %v273_v60  ;;  %v276_v2 = vadd.f32 %v275_v0, %v133_v46 }
 0x121   :  { %346 = vst.msk [vmem:[#allocation8 + $0x28] sm:$0xf] %vm335_vm1, %v402_v62  ;;  %v403_v3 = vpack.c.bf16 %v284_v63, %v284_v63 }
 0x122   :  { %344 = vst.msk [vmem:[#allocation8 + $0x20] sm:$0xf] %vm335_vm1, %v400_v1  ;;  %v401_v4 = vpack.c.bf16 %v276_v2, %v276_v2 }
 0x123   :  { %347 = vst.msk [vmem:[#allocation8 + $0x2c] sm:$0xf] %vm335_vm1, %v403_v3 }
 0x124   :  { %345 = vst.msk [vmem:[#allocation8 + $0x24] sm:$0xf] %vm335_vm1, %v401_v4 }
 0x125   :  { %528 = shalt.err (!%p525_p0)
}
 0x126   :  { %s529_s29 = scalar_lea.hbm %s659_s3, 768 }
 0x127   :  { %p530_p1 = scmp.ne.s32.totalorder %s659_s3, %s529_s29  ;;  %p533_p2 = scmp.lt.u32.totalorder %s529_s29, %s659_s3 }
 0x129   :  { %p535_p3 = pnand %p533_p2, %p530_p1 }
 0x12b   :  { %538 = shalt.err (!%p535_p3)
}
 0x12c   :  { %359 = dma.vmem_to_hbm [thread:$0]  %s354_s23, 768, %s659_s3, [#allocation4], %s547_s24, %s547_s24, %s548_s25  }
 0x12d   :  { %543 = dma.done.wait [#allocation4], 768  }
 0x12e   :  { %544 = vsyncadd [#allocation4], 4294966528 }
 0x12f   :  { %363 = vsyncpa [#allocation3], 1 }
 0x130   :  { %364 = vsyncpa [#allocation6], 1 }
 0x131   :  { %365 = vsyncpa [#allocation4], 1 }

</bundles_post_ra>
